<compile_context>
chip_gen: v7x
topology: tpu7x:2x2x1
jax: 0.10.0
libtpu: 0.0.40
codegen_flags: <defaults>
</compile_context>

<pallas_src>
import functools

import jax
import jax.numpy as jnp
from jax.experimental import pallas as pl
from jax.experimental.pallas import tpu as pltpu

# Problem sizes (small, consistent with the module's forward).
SEQ = 8           # seq_len
BATCH = 2         # batch_size
HIDDEN = 128      # hidden_size
EXPERTS = 4       # num_experts
GATE_PAD = 128    # gate fc2 output padded to a full lane tile
INIT_LAMBDA = 0.2


def _dict_moe_kernel(x_ref, slab_ref, b1_ref, w2_ref, b2_ref, bb_ref, db_ref, o_ref,
                     *, batch_size):
    """Single invocation over all B*S tokens (row r of x belongs to sample r % B).

    x_ref    : (N, H)            f32   flattened tokens, N = S*B, row-major from (S, B, H)
    slab_ref : (H, (2+E)*H)      bf16  [W1 | W_base | dW_0 .. dW_{E-1}]
    b1_ref   : (1, H)            f32   gate fc1 bias
    w2_ref   : (H, GATE_PAD)     bf16  gate fc2 weight (lane-padded with zeros)
    b2_ref   : (1, GATE_PAD)     f32   gate fc2 bias   (lane-padded with zeros)
    bb_ref   : (1, H)            f32   base linear bias
    db_ref   : (E, H)            f32   expert task-vector biases
    o_ref    : (N, H)            f32   output tokens
    """
    N, H = x_ref.shape
    E = db_ref.shape[0]
    B = batch_size
    S = N // B

    # ---- one full-width MXU pass over the fused weight slab ----
    x = x_ref[...].astype(jnp.bfloat16)                                   # (N, H) bf16
    mm = jnp.dot(x, slab_ref[...], preferred_element_type=jnp.float32)    # (N, (2+E)*H) f32

    # ---- gate: relu(fc1), per-sample mean over the sequence, then fc2 ----
    h = jnp.maximum(mm[:, 0:H] + b1_ref[...], 0.0)                        # (N, H) f32
    row_batch = jax.lax.broadcasted_iota(jnp.int32, (N, 1), 0) % B        # (N, 1) sample id
    g_rows = jnp.zeros((N, w2_ref.shape[1]), jnp.float32)                 # per-row gate weights
    inv_s = 1.0 / S
    for b in range(B):                                                    # B = 2, unrolled
        mask = row_batch == b                                             # (N, 1) bool
        h_mean = jnp.sum(jnp.where(mask, h, 0.0), axis=0, keepdims=True) * inv_s   # (1, H)
        g_b = jnp.dot(h_mean.astype(jnp.bfloat16), w2_ref[...],
                      preferred_element_type=jnp.float32) + b2_ref[...]   # (1, GATE_PAD)
        g_rows = g_rows + jnp.where(mask, g_b, 0.0)                       # scatter to sample rows

    # ---- combine: out = y_base + b_base + sum_e g_e * (y_e + db_e) ----
    dbv = db_ref[...]                                                     # (E, H) f32
    out = mm[:, H:2 * H] + bb_ref[...]                                    # (N, H) f32
    for e in range(E):                                                    # E = 4, unrolled
        y_e = mm[:, (2 + e) * H:(3 + e) * H]                              # (N, H) f32
        out = out + g_rows[:, e:e + 1] * (y_e + dbv[e:e + 1, :])
    o_ref[...] = out.astype(o_ref.dtype)


def prepare_params(params):
    """One-time conversion of module parameters into the kernel layout / dtypes.

    Builds the fused (H, (2+E)*H) bf16 weight slab [W1 | W_base | dW_e...] and the
    lane-padded gate fc2.  Runs once at parameter-prep time, not per forward.
    """
    w1, b1, w2, b2, wb, bb, dw, db = params
    H = w1.shape[0]
    E = dw.shape[0]
    slab = jnp.concatenate([w1, wb] + [dw[e] for e in range(E)],
                           axis=1).astype(jnp.bfloat16)                   # (H, (2+E)*H)
    w2p = (jnp.zeros((H, GATE_PAD), jnp.float32).at[:, :E].set(w2)
           ).astype(jnp.bfloat16)
    b2p = jnp.zeros((1, GATE_PAD), jnp.float32).at[:, :E].set(b2)
    return (slab, b1, w2p, b2p, bb, db)


@jax.jit
def dict_moe_pallas(x_sbh, prepared):
    """x_sbh: (S, B, H) float32 (batch_first=False).  Returns (S, B, H) float32."""
    slab, b1, w2p, b2p, bb, db = prepared
    S, B, H = x_sbh.shape
    E = db.shape[0]
    N = S * B

    # (S, B, H) row-major -> (S*B, H): contiguous reshape (bitcast, no transpose / no copy).
    x2d = x_sbh.reshape(N, H)

    kernel = functools.partial(_dict_moe_kernel, batch_size=B)
    vmem = pl.BlockSpec(memory_space=pltpu.MemorySpace.VMEM)

    flops = (2 * N * H * (2 + E) * H      # fused X @ [W1|Wb|dW...] matmul
             + 2 * B * H * GATE_PAD       # gate fc2 (per-sample, lane-padded)
             + 3 * N * H * E              # per-expert VPU combine
             + 2 * N * H)                 # bias adds
    in_arrays = (x2d, slab, b1, w2p, b2p, bb, db)
    bytes_accessed = (sum(int(a.size) * a.dtype.itemsize for a in in_arrays)
                      + N * H * 4)

    out2d = pl.pallas_call(
        kernel,
        out_shape=jax.ShapeDtypeStruct((N, H), jnp.float32),
        in_specs=[vmem] * len(in_arrays),
        out_specs=vmem,
        cost_estimate=pl.CostEstimate(
            flops=flops, transcendentals=0, bytes_accessed=bytes_accessed),
    )(*in_arrays)

    return out2d.reshape(S, B, H)


def dict_moe_reference(x_sbh, params):
    """Pure-JAX f32 reference mirroring the PyTorch forward (module semantics)."""
    w1, b1, w2, b2, wb, bb, dw, db = params
    x = jnp.transpose(x_sbh, (1, 0, 2))                        # (B, S, H)
    h = jax.nn.relu(x @ w1 + b1)
    g = (h @ w2 + b2).mean(axis=1)                             # (B, E)
    w_m = wb[None] + jnp.einsum("be,ehk->bhk", g, dw)          # (B, H, H)
    b_m = bb + g @ db                                          # (B, H)
    out = jnp.einsum("bsh,bhk->bsk", x, w_m) + b_m[:, None, :]
    return jnp.transpose(out, (1, 0, 2))


def make_params(key):
    ks = jax.random.split(key, 7)
    H, E = HIDDEN, EXPERTS
    w1 = 0.01 * jax.random.normal(ks[0], (H, H), jnp.float32)          # gate fc1 (std=0.01)
    b1 = jnp.zeros((1, H), jnp.float32)
    w2 = 0.01 * jax.random.normal(ks[1], (H, E), jnp.float32)          # gate fc2 (std=0.01)
    b2 = jnp.full((1, E), INIT_LAMBDA, jnp.float32)                    # bias = init_lambda
    wb = jax.random.normal(ks[2], (H, H), jnp.float32) / jnp.sqrt(H)   # base Linear weight
    bb = 0.01 * jax.random.normal(ks[3], (1, H), jnp.float32)          # base Linear bias
    # expert task vectors (expert_param - base_param), generated directly
    dw = 0.1 * jax.random.normal(ks[4], (E, H, H), jnp.float32) / jnp.sqrt(H)
    db = 0.01 * jax.random.normal(ks[5], (E, H), jnp.float32)
    return (w1, b1, w2, b2, wb, bb, dw, db)


if __name__ == "__main__":
    key = jax.random.PRNGKey(0)
    pkey, xkey = jax.random.split(key)
    params = make_params(pkey)
    prepared = prepare_params(params)   # one-time layout / dtype prep (not per-call)
    # batch_first=False input: (seq, batch, hidden)
    x = jax.random.normal(xkey, (SEQ, BATCH, HIDDEN), jnp.float32)

    out = jax.block_until_ready(dict_moe_pallas(x, prepared))
    ref = jax.block_until_ready(dict_moe_reference(x, params))

    assert out.shape == (SEQ, BATCH, HIDDEN), out.shape
    # bf16 weight/activation streams -> looser tolerance vs. the f32 reference.
    assert jnp.allclose(out, ref, rtol=5e-2, atol=5e-2), float(jnp.max(jnp.abs(out - ref)))
    print("KERNEL_OK")
</pallas_src>

<mosaic_0001>
module attributes {stable_mosaic.version = 11 : i64} {
  func.func @_dict_moe_kernel(%arg0: memref<16x128xf32, #tpu.memory_space<vmem>>, %arg1: memref<128x768xbf16, #tpu.memory_space<vmem>>, %arg2: memref<1x128xf32, #tpu.memory_space<vmem>>, %arg3: memref<128x128xbf16, #tpu.memory_space<vmem>>, %arg4: memref<1x128xf32, #tpu.memory_space<vmem>>, %arg5: memref<1x128xf32, #tpu.memory_space<vmem>>, %arg6: memref<4x128xf32, #tpu.memory_space<vmem>>, %arg7: memref<16x128xf32, #tpu.memory_space<vmem>>) attributes {dimension_semantics = [], scalar_prefetch = 0 : i64, scratch_operands = 0 : i64, tpu.core_type = #tpu.core_type<tc>} {
    %c0 = arith.constant 0 : index
    %c0_0 = arith.constant 0 : index
    %0 = vector.load %arg0[%c0, %c0_0] : memref<16x128xf32, #tpu.memory_space<vmem>>, vector<16x128xf32>
    %1 = arith.truncf %0 : vector<16x128xf32> to vector<16x128xbf16>
    %c0_1 = arith.constant 0 : index
    %c0_2 = arith.constant 0 : index
    %2 = vector.load %arg1[%c0_1, %c0_2] : memref<128x768xbf16, #tpu.memory_space<vmem>>, vector<128x768xbf16>
    %cst = arith.constant dense<0.000000e+00> : vector<16x768xf32>
    %3 = tpu.matmul %1, %2, %cst {dimension_numbers = #tpu.dot_dimension_numbers<[1], [0], [0], [1], [0, 0, 1, 1], [], []>} : vector<16x128xbf16>, vector<128x768xbf16>, vector<16x768xf32> -> vector<16x768xf32>
    %4 = vector.extract_strided_slice %3 {offsets = [0, 0], sizes = [16, 128], strides = [1, 1]} : vector<16x768xf32> to vector<16x128xf32>
    %c0_3 = arith.constant 0 : index
    %c0_4 = arith.constant 0 : index
    %5 = vector.load %arg2[%c0_3, %c0_4] : memref<1x128xf32, #tpu.memory_space<vmem>>, vector<1x128xf32>
    %6 = vector.broadcast %5 : vector<1x128xf32> to vector<16x128xf32>
    %7 = arith.addf %4, %6 : vector<16x128xf32>
    %cst_5 = arith.constant 0.000000e+00 : f32
    %8 = vector.broadcast %cst_5 : f32 to vector<16x128xf32>
    %9 = arith.maximumf %7, %8 : vector<16x128xf32>
    %10 = tpu.iota {dimensions = array<i32: 0>} : vector<16x1xi32>
    %c2_i32 = arith.constant 2 : i32
    %c0_i32 = arith.constant 0 : i32
    %11 = arith.cmpi eq, %c2_i32, %c0_i32 : i32
    %c1_i32 = arith.constant 1 : i32
    %12 = arith.select %11, %c1_i32, %c2_i32 : i32
    %13 = vector.broadcast %12 : i32 to vector<16x1xi32>
    %14 = arith.remsi %10, %13 : vector<16x1xi32>
    %c0_i32_6 = arith.constant 0 : i32
    %15 = vector.broadcast %c0_i32_6 : i32 to vector<16x1xi32>
    %16 = arith.cmpi ne, %14, %15 : vector<16x1xi32>
    %c0_i32_7 = arith.constant 0 : i32
    %17 = vector.broadcast %c0_i32_7 : i32 to vector<16x1xi32>
    %18 = arith.cmpi slt, %14, %17 : vector<16x1xi32>
    %c0_i32_8 = arith.constant 0 : i32
    %19 = arith.cmpi slt, %12, %c0_i32_8 : i32
    %20 = vector.broadcast %19 : i1 to vector<16x1xi1>
    %21 = vector.broadcast %20 : vector<16x1xi1> to vector<16x1xi1>
    %22 = arith.xori %18, %21 : vector<16x1xi1>
    %23 = arith.andi %22, %16 : vector<16x1xi1>
    %24 = vector.broadcast %12 : i32 to vector<16x1xi32>
    %25 = arith.addi %14, %24 : vector<16x1xi32>
    %26 = arith.select %23, %25, %14 : vector<16x1xi1>, vector<16x1xi32>
    %cst_9 = arith.constant 0.000000e+00 : f32
    %27 = vector.broadcast %cst_9 : f32 to vector<16x128xf32>
    %c0_i32_10 = arith.constant 0 : i32
    %28 = vector.broadcast %c0_i32_10 : i32 to vector<16x1xi32>
    %29 = arith.cmpi eq, %26, %28 : vector<16x1xi32>
    %cst_11 = arith.constant 0.000000e+00 : f32
    %30 = vector.shape_cast %29 : vector<16x1xi1> to vector<16x1xi1>
    %31 = vector.broadcast %30 : vector<16x1xi1> to vector<16x128xi1>
    %32 = vector.broadcast %cst_11 : f32 to vector<16x128xf32>
    %33 = arith.select %31, %9, %32 : vector<16x128xi1>, vector<16x128xf32>
    %cst_12 = arith.constant dense<0.000000e+00> : vector<128xf32>
    %34 = vector.multi_reduction <add>, %33, %cst_12 [0] : vector<16x128xf32> to vector<128xf32>
    %35 = vector.shape_cast %34 : vector<128xf32> to vector<1x128xf32>
    %cst_13 = arith.constant 1.250000e-01 : f32
    %36 = vector.broadcast %cst_13 : f32 to vector<1x128xf32>
    %37 = arith.mulf %35, %36 : vector<1x128xf32>
    %38 = arith.truncf %37 : vector<1x128xf32> to vector<1x128xbf16>
    %c0_14 = arith.constant 0 : index
    %c0_15 = arith.constant 0 : index
    %39 = vector.load %arg3[%c0_14, %c0_15] : memref<128x128xbf16, #tpu.memory_space<vmem>>, vector<128x128xbf16>
    %cst_16 = arith.constant dense<0.000000e+00> : vector<1x128xf32>
    %40 = tpu.matmul %38, %39, %cst_16 {dimension_numbers = #tpu.dot_dimension_numbers<[1], [0], [0], [1], [0, 0, 1, 1], [], []>} : vector<1x128xbf16>, vector<128x128xbf16>, vector<1x128xf32> -> vector<1x128xf32>
    %c0_17 = arith.constant 0 : index
    %c0_18 = arith.constant 0 : index
    %41 = vector.load %arg4[%c0_17, %c0_18] : memref<1x128xf32, #tpu.memory_space<vmem>>, vector<1x128xf32>
    %42 = arith.addf %40, %41 : vector<1x128xf32>
    %cst_19 = arith.constant 0.000000e+00 : f32
    %43 = vector.shape_cast %29 : vector<16x1xi1> to vector<16x1xi1>
    %44 = vector.broadcast %43 : vector<16x1xi1> to vector<16x128xi1>
    %45 = vector.shape_cast %42 : vector<1x128xf32> to vector<1x128xf32>
    %46 = vector.broadcast %45 : vector<1x128xf32> to vector<16x128xf32>
    %47 = vector.broadcast %cst_19 : f32 to vector<16x128xf32>
    %48 = arith.select %44, %46, %47 : vector<16x128xi1>, vector<16x128xf32>
    %49 = arith.addf %27, %48 : vector<16x128xf32>
    %c1_i32_20 = arith.constant 1 : i32
    %50 = vector.broadcast %c1_i32_20 : i32 to vector<16x1xi32>
    %51 = arith.cmpi eq, %26, %50 : vector<16x1xi32>
    %cst_21 = arith.constant 0.000000e+00 : f32
    %52 = vector.shape_cast %51 : vector<16x1xi1> to vector<16x1xi1>
    %53 = vector.broadcast %52 : vector<16x1xi1> to vector<16x128xi1>
    %54 = vector.broadcast %cst_21 : f32 to vector<16x128xf32>
    %55 = arith.select %53, %9, %54 : vector<16x128xi1>, vector<16x128xf32>
    %cst_22 = arith.constant dense<0.000000e+00> : vector<128xf32>
    %56 = vector.multi_reduction <add>, %55, %cst_22 [0] : vector<16x128xf32> to vector<128xf32>
    %57 = vector.shape_cast %56 : vector<128xf32> to vector<1x128xf32>
    %cst_23 = arith.constant 1.250000e-01 : f32
    %58 = vector.broadcast %cst_23 : f32 to vector<1x128xf32>
    %59 = arith.mulf %57, %58 : vector<1x128xf32>
    %60 = arith.truncf %59 : vector<1x128xf32> to vector<1x128xbf16>
    %c0_24 = arith.constant 0 : index
    %c0_25 = arith.constant 0 : index
    %61 = vector.load %arg3[%c0_24, %c0_25] : memref<128x128xbf16, #tpu.memory_space<vmem>>, vector<128x128xbf16>
    %cst_26 = arith.constant dense<0.000000e+00> : vector<1x128xf32>
    %62 = tpu.matmul %60, %61, %cst_26 {dimension_numbers = #tpu.dot_dimension_numbers<[1], [0], [0], [1], [0, 0, 1, 1], [], []>} : vector<1x128xbf16>, vector<128x128xbf16>, vector<1x128xf32> -> vector<1x128xf32>
    %c0_27 = arith.constant 0 : index
    %c0_28 = arith.constant 0 : index
    %63 = vector.load %arg4[%c0_27, %c0_28] : memref<1x128xf32, #tpu.memory_space<vmem>>, vector<1x128xf32>
    %64 = arith.addf %62, %63 : vector<1x128xf32>
    %cst_29 = arith.constant 0.000000e+00 : f32
    %65 = vector.shape_cast %51 : vector<16x1xi1> to vector<16x1xi1>
    %66 = vector.broadcast %65 : vector<16x1xi1> to vector<16x128xi1>
    %67 = vector.shape_cast %64 : vector<1x128xf32> to vector<1x128xf32>
    %68 = vector.broadcast %67 : vector<1x128xf32> to vector<16x128xf32>
    %69 = vector.broadcast %cst_29 : f32 to vector<16x128xf32>
    %70 = arith.select %66, %68, %69 : vector<16x128xi1>, vector<16x128xf32>
    %71 = arith.addf %49, %70 : vector<16x128xf32>
    %c0_30 = arith.constant 0 : index
    %c0_31 = arith.constant 0 : index
    %72 = vector.load %arg6[%c0_30, %c0_31] : memref<4x128xf32, #tpu.memory_space<vmem>>, vector<4x128xf32>
    %73 = vector.extract_strided_slice %3 {offsets = [0, 128], sizes = [16, 128], strides = [1, 1]} : vector<16x768xf32> to vector<16x128xf32>
    %c0_32 = arith.constant 0 : index
    %c0_33 = arith.constant 0 : index
    %74 = vector.load %arg5[%c0_32, %c0_33] : memref<1x128xf32, #tpu.memory_space<vmem>>, vector<1x128xf32>
    %75 = vector.broadcast %74 : vector<1x128xf32> to vector<16x128xf32>
    %76 = arith.addf %73, %75 : vector<16x128xf32>
    %77 = vector.extract_strided_slice %3 {offsets = [0, 256], sizes = [16, 128], strides = [1, 1]} : vector<16x768xf32> to vector<16x128xf32>
    %78 = vector.extract_strided_slice %71 {offsets = [0, 0], sizes = [16, 1], strides = [1, 1]} : vector<16x128xf32> to vector<16x1xf32>
    %79 = vector.extract_strided_slice %72 {offsets = [0, 0], sizes = [1, 128], strides = [1, 1]} : vector<4x128xf32> to vector<1x128xf32>
    %80 = vector.broadcast %79 : vector<1x128xf32> to vector<16x128xf32>
    %81 = arith.addf %77, %80 : vector<16x128xf32>
    %82 = vector.broadcast %78 : vector<16x1xf32> to vector<16x128xf32>
    %83 = arith.mulf %82, %81 : vector<16x128xf32>
    %84 = arith.addf %76, %83 : vector<16x128xf32>
    %85 = vector.extract_strided_slice %3 {offsets = [0, 384], sizes = [16, 128], strides = [1, 1]} : vector<16x768xf32> to vector<16x128xf32>
    %86 = vector.extract_strided_slice %71 {offsets = [0, 1], sizes = [16, 1], strides = [1, 1]} : vector<16x128xf32> to vector<16x1xf32>
    %87 = vector.extract_strided_slice %72 {offsets = [1, 0], sizes = [1, 128], strides = [1, 1]} : vector<4x128xf32> to vector<1x128xf32>
    %88 = vector.broadcast %87 : vector<1x128xf32> to vector<16x128xf32>
    %89 = arith.addf %85, %88 : vector<16x128xf32>
    %90 = vector.broadcast %86 : vector<16x1xf32> to vector<16x128xf32>
    %91 = arith.mulf %90, %89 : vector<16x128xf32>
    %92 = arith.addf %84, %91 : vector<16x128xf32>
    %93 = vector.extract_strided_slice %3 {offsets = [0, 512], sizes = [16, 128], strides = [1, 1]} : vector<16x768xf32> to vector<16x128xf32>
    %94 = vector.extract_strided_slice %71 {offsets = [0, 2], sizes = [16, 1], strides = [1, 1]} : vector<16x128xf32> to vector<16x1xf32>
    %95 = vector.extract_strided_slice %72 {offsets = [2, 0], sizes = [1, 128], strides = [1, 1]} : vector<4x128xf32> to vector<1x128xf32>
    %96 = vector.broadcast %95 : vector<1x128xf32> to vector<16x128xf32>
    %97 = arith.addf %93, %96 : vector<16x128xf32>
    %98 = vector.broadcast %94 : vector<16x1xf32> to vector<16x128xf32>
    %99 = arith.mulf %98, %97 : vector<16x128xf32>
    %100 = arith.addf %92, %99 : vector<16x128xf32>
    %101 = vector.extract_strided_slice %3 {offsets = [0, 640], sizes = [16, 128], strides = [1, 1]} : vector<16x768xf32> to vector<16x128xf32>
    %102 = vector.extract_strided_slice %71 {offsets = [0, 3], sizes = [16, 1], strides = [1, 1]} : vector<16x128xf32> to vector<16x1xf32>
    %103 = vector.extract_strided_slice %72 {offsets = [3, 0], sizes = [1, 128], strides = [1, 1]} : vector<4x128xf32> to vector<1x128xf32>
    %104 = vector.broadcast %103 : vector<1x128xf32> to vector<16x128xf32>
    %105 = arith.addf %101, %104 : vector<16x128xf32>
    %106 = vector.broadcast %102 : vector<16x1xf32> to vector<16x128xf32>
    %107 = arith.mulf %106, %105 : vector<16x128xf32>
    %108 = arith.addf %100, %107 : vector<16x128xf32>
    %c0_34 = arith.constant 0 : index
    %c0_35 = arith.constant 0 : index
    %109 = vector.load %arg7[%c0_34, %c0_35] : memref<16x128xf32, #tpu.memory_space<vmem>>, vector<16x128xf32>
    tpu.vector_store %arg7[%c0_34, %c0_35], %108 {strides = array<i32>} : memref<16x128xf32, #tpu.memory_space<vmem>>, vector<16x128xf32>,
    return
  }
}

</mosaic_0001>

<bundles_post_ra>
// kernel: dict_moe_pallas.1
= control target key start
LH: loop header
LB: loop body
LE: loop exit
PB: predicated region body
PF: predicated region fallthrough
CT: control target
= control target key end

     0   :  { %12 = vsyncpa [#allocation3], 0  ;;  %s1337_s0 = inlined_call_operand.hbm [shape: f32[16,128], index: 0, kind: input, shape index: {}]   ;;  %s1338_s1 = inlined_call_operand.hbm [shape: bf16[128,768], index: 1, kind: input, shape index: {}]   ;;  %s1339_s2 = inlined_call_operand.vmem [shape: f32[1,128], index: 2, kind: input, shape index: {}]   ;;  %s1340_s3 = inlined_call_operand.hbm [shape: bf16[128,128], index: 3, kind: input, shape index: {}]   ;;  %s1341_s4 = inlined_call_operand.vmem [shape: f32[1,128], index: 4, kind: input, shape index: {}]   ;;  %s1342_s5 = inlined_call_operand.vmem [shape: f32[1,128], index: 5, kind: input, shape index: {}]   ;;  %s1343_s6 = inlined_call_operand.vmem [shape: f32[4,128], index: 6, kind: input, shape index: {}]   ;;  %s1344_s7 = inlined_call_operand.hbm [shape: f32[16,128], index: 7, kind: output, shape index: {}]  }
   0x1   :  { %13 = vsyncpa [#allocation6], 0 }
   0x2   :  { %14 = vsyncpa [#allocation4], 0  ;;  %s1138_s24 = smov [#allocation5]   ;;  %s1044_s28 = scalar_lea.hbm %s1338_s1, 6144 }
   0x3   :  { %s32_s25 = sshll.u32 %s1138_s24, 4  ;;  %p1045_p0 = scmp.ne.s32.totalorder %s1338_s1, %s1044_s28  ;;  %s33_s25 = int_to_ptr.vmem [resolvable:$true] %s32_s25 }
   0x4   :  { %p1048_p1 = scmp.lt.u32.totalorder %s1044_s28, %s1338_s1 }
   0x6   :  { %p1050_p2 = pnand %p1048_p1, %p1045_p0 }
   0x8   :  { %1053 = shalt.err (!%p1050_p2)
}
   0x9   :  { %s1054_s10 = scalar_lea.vmem %s33_s25, 6144  ;;  %p1059_p4 = scmp.lt.s32.totalorder %s33_s25, %s33_s25 }
   0xa   :  { %p1055_p3 = scmp.ne.s32.totalorder %s33_s25, %s1054_s10  ;;  %p1060_p5 = scmp.lt.s32.totalorder %s1054_s10, %s1054_s10 }
   0xc   :  { %p1061_p6 = por %p1060_p5, %p1059_p4 }
   0xe   :  { %p1062_p7 = pnand %p1061_p6, %p1055_p3 }
  0x10   :  { %1065 = shalt.err (!%p1062_p7)
}
  0x11   :  { %s1139_s11 = smov 384   ;;  %s1140_s12 = smov 24  }
  0x12   :  { %38 = dma.hbm_to_vmem [thread:$0]  %s1338_s1, 6144, %s33_s25, [#allocation6], %s1139_s11, %s1139_s11, %s1140_s12  }
  0x13   :  { %s1141_s15 = smov [#allocation2]   ;;  %s1066_s19 = scalar_lea.hbm %s1337_s0, 256 }
  0x14   :  { %s20_s16 = sshll.u32 %s1141_s15, 4  ;;  %p1067_p8 = scmp.ne.s32.totalorder %s1337_s0, %s1066_s19  ;;  %s21_s16 = int_to_ptr.vmem [resolvable:$true] %s20_s16 }
  0x15   :  { %p1070_p9 = scmp.lt.u32.totalorder %s1066_s19, %s1337_s0 }
  0x17   :  { %p1072_p10 = pnand %p1070_p9, %p1067_p8 }
  0x19   :  { %1075 = shalt.err (!%p1072_p10)
}
  0x1a   :  { %s1076_s24 = scalar_lea.vmem %s21_s16, 256  ;;  %p1081_p12 = scmp.lt.s32.totalorder %s21_s16, %s21_s16 }
  0x1b   :  { %p1077_p11 = scmp.ne.s32.totalorder %s21_s16, %s1076_s24  ;;  %p1082_p13 = scmp.lt.s32.totalorder %s1076_s24, %s1076_s24 }
  0x1d   :  { %p1083_p0 = por %p1082_p13, %p1081_p12 }
  0x1f   :  { %p1084_p1 = pnand %p1083_p0, %p1077_p11 }
  0x21   :  { %1087 = shalt.err (!%p1084_p1)
}
  0x22   :  { %s1142_s1 = smov 128   ;;  %s1143_s25 = smov 8  }
  0x23   :  { %26 = dma.hbm_to_vmem [thread:$0]  %s1337_s0, 256, %s21_s16, [#allocation3], %s1142_s1, %s1142_s1, %s1143_s25  }
  0x24   :  { %s1144_s28 = smov [#allocation7]   ;;  %s1088_s9 = scalar_lea.hbm %s1340_s3, 1024 }
  0x25   :  { %s46_s29 = sshll.u32 %s1144_s28, 4  ;;  %p1089_p2 = scmp.ne.s32.totalorder %s1340_s3, %s1088_s9  ;;  %s47_s29 = int_to_ptr.vmem [resolvable:$true] %s46_s29 }
  0x26   :  { %p1092_p3 = scmp.lt.u32.totalorder %s1088_s9, %s1340_s3 }
  0x28   :  { %p1094_p4 = pnand %p1092_p3, %p1089_p2 }
  0x2a   :  { %1097 = shalt.err (!%p1094_p4)
}
  0x2b   :  { %s1098_s14 = scalar_lea.vmem %s47_s29, 1024  ;;  %p1103_p6 = scmp.lt.s32.totalorder %s47_s29, %s47_s29 }
  0x2c   :  { %p1099_p5 = scmp.ne.s32.totalorder %s47_s29, %s1098_s14  ;;  %p1104_p7 = scmp.lt.s32.totalorder %s1098_s14, %s1098_s14 }
  0x2e   :  { %p1105_p8 = por %p1104_p7, %p1103_p6 }
  0x30   :  { %p1106_p9 = pnand %p1105_p8, %p1099_p5 }
  0x32   :  { %1109 = shalt.err (!%p1106_p9)
}
  0x33   :  { %s1145_s0 = smov 64   ;;  %s1146_s15 = smov 4  }
  0x34   :  { %52 = dma.hbm_to_vmem [thread:$0]  %s1340_s3, 1024, %s47_s29, [#allocation6], %s1145_s0, %s1145_s0, %s1146_s15  }
  0x35   :  { %1132 = dma.done.wait [#allocation3], 256  }
  0x36   :  { %1133 = vsyncadd [#allocation3], 4294967040 }
  0x37   :  { %1134 = dma.done.wait [#allocation6], 7168  }
  0x38   :  { %1135 = vsyncadd [#allocation6], 4294960128  ;;  %v1147_v0 = vmov 0   ;;  %v964_v1 = vld [vmem:[#allocation5 + $0x4] ss:$24 sps:$4 sm:$0xff]   ;;  %v69_v26 = vld [vmem:[#allocation2] sm:$0xff]  ;;  %v500_v61 = vlaneseq }
  0x39   :  { %392 = vmatprep.mubr.bf16.mxu0 %v1147_v0  ;;  %435 = vmatprep.mubr.bf16.mxu1 %v1147_v0  ;;  %v966_v2 = vld [vmem:[#allocation5] ss:$24 sps:$4 sm:$0xff]   ;;  %v967_v3 = vld [vmem:[#allocation5 + $0x34] ss:$24 sps:$4 sm:$0xff]   ;;  %v969_v4 = vld [vmem:[#allocation5 + $0x30] ss:$24 sps:$4 sm:$0xff]  }
  0x3a   :  { %958 = vset.pattern.permute.xlu0 %v1147_v0  ;;  %360 = vmatprep.subr.bf16.mxu0 %v964_v1  ;;  %v970_v5 = vld [vmem:[#allocation5 + $0x64] ss:$24 sps:$4 sm:$0xff]   ;;  %v972_v6 = vld [vmem:[#allocation5 + $0x60] ss:$24 sps:$4 sm:$0xff]   ;;  %v973_v7 = vld [vmem:[#allocation5 + $0x94] ss:$24 sps:$4 sm:$0xff]  }
  0x3b   :  { %361 = vmatpush1.bf16.msra.mxu0 %v966_v2  ;;  %v975_v8 = vld [vmem:[#allocation5 + $0x90] ss:$24 sps:$4 sm:$0xff]   ;;  %v976_v9 = vld [vmem:[#allocation5 + $0xc4] ss:$24 sps:$4 sm:$0xff]   ;;  %v978_v13 = vld [vmem:[#allocation5 + $0xc0] ss:$24 sps:$4 sm:$0xff]  }
  0x3c   :  { %362 = vmatprep.subr.bf16.mxu0 %v967_v3  ;;  %v988_v10 = vld [vmem:[#allocation5 + $0xc] ss:$24 sps:$4 sm:$0xff]   ;;  %v993_v11 = vld [vmem:[#allocation5 + $0x8] ss:$24 sps:$4 sm:$0xff]   ;;  %v994_v12 = vld [vmem:[#allocation5 + $0x3c] ss:$24 sps:$4 sm:$0xff]  }
  0x3d   :  { %403 = vmatprep.subr.bf16.mxu1 %v988_v10  ;;  %v979_v14 = vld [vmem:[#allocation5 + $0xf4] ss:$24 sps:$4 sm:$0xff]   ;;  %v999_v15 = vld [vmem:[#allocation5 + $0x38] ss:$24 sps:$4 sm:$0xff]   ;;  %v982_v18 = vld [vmem:[#allocation5 + $0x124] ss:$24 sps:$4 sm:$0xff]  }
  0x3e   :  { %404 = vmatpush1.bf16.msra.mxu1 %v993_v11  ;;  %v1000_v16 = vld [vmem:[#allocation5 + $0x6c] ss:$24 sps:$4 sm:$0xff]   ;;  %v981_v17 = vld [vmem:[#allocation5 + $0xf0] ss:$24 sps:$4 sm:$0xff]   ;;  %v1006_v20 = vld [vmem:[#allocation5 + $0x9c] ss:$24 sps:$4 sm:$0xff]  }
  0x3f   :  { %363 = vmatpush1.bf16.msra.mxu0 %v969_v4  ;;  %405 = vmatprep.subr.bf16.mxu1 %v994_v12  ;;  %v1005_v19 = vld [vmem:[#allocation5 + $0x68] ss:$24 sps:$4 sm:$0xff]   ;;  %v1011_v22 = vld [vmem:[#allocation5 + $0x98] ss:$24 sps:$4 sm:$0xff]   ;;  %v985_v23 = vld [vmem:[#allocation5 + $0x154] ss:$24 sps:$4 sm:$0xff]  }
  0x40   :  { %364 = vmatprep.subr.bf16.mxu0 %v970_v5  ;;  %v984_v21 = vld [vmem:[#allocation5 + $0x120] ss:$24 sps:$4 sm:$0xff]   ;;  %v1012_v24 = vld [vmem:[#allocation5 + $0xcc] ss:$24 sps:$4 sm:$0xff]   ;;  %v987_v25 = vld [vmem:[#allocation5 + $0x150] ss:$24 sps:$4 sm:$0xff]  }
  0x41   :  { %v70_v27 = vld [vmem:[#allocation2 + $0x8] sm:$0xff]  ;;  %v992_v28 = vld [vmem:[#allocation5 + $0x14] ss:$24 sps:$4 sm:$0xff]   ;;  %v1017_v29 = vld [vmem:[#allocation5 + $0xc8] ss:$24 sps:$4 sm:$0xff]   ;;  %v1148_v46 = vmov 0.0  }
  0x42   :  { %406 = vmatpush1.bf16.msra.mxu1 %v999_v15  ;;  %v1018_v30 = vld [vmem:[#allocation5 + $0xfc] ss:$24 sps:$4 sm:$0xff]   ;;  %v71_v31 = vpack.c.bf16 %v70_v27, %v69_v26  ;;  %v990_v32 = vld [vmem:[#allocation5 + $0x10] ss:$24 sps:$4 sm:$0xff]   ;;  %v1024_v35 = vld [vmem:[#allocation5 + $0x12c] ss:$24 sps:$4 sm:$0xff]  }
  0x43   :  { %365 = vmatpush1.bf16.msra.mxu0 %v972_v6  ;;  %407 = vmatprep.subr.bf16.mxu1 %v1000_v16  ;;  %v1023_v33 = vld [vmem:[#allocation5 + $0xf8] ss:$24 sps:$4 sm:$0xff]   ;;  %v998_v34 = vld [vmem:[#allocation5 + $0x44] ss:$24 sps:$4 sm:$0xff]   ;;  %v1029_v37 = vld [vmem:[#allocation5 + $0x128] ss:$24 sps:$4 sm:$0xff]  }
  0x44   :  { %366 = vmatprep.subr.bf16.mxu0 %v973_v7  ;;  %v996_v36 = vld [vmem:[#allocation5 + $0x40] ss:$24 sps:$4 sm:$0xff]   ;;  %v1004_v38 = vld [vmem:[#allocation5 + $0x74] ss:$24 sps:$4 sm:$0xff]   ;;  %v1002_v40 = vld [vmem:[#allocation5 + $0x70] ss:$24 sps:$4 sm:$0xff]  }
  0x45   :  { %v1030_v39 = vld [vmem:[#allocation5 + $0x15c] ss:$24 sps:$4 sm:$0xff]   ;;  %v1035_v41 = vld [vmem:[#allocation5 + $0x158] ss:$24 sps:$4 sm:$0xff]   ;;  %v1036_v44 = vld [vmem:[#allocation7] sm:$0xff]   ;;  %vm1149_vm0 = vmmov 0  }
  0x46   :  { %408 = vmatpush1.bf16.msra.mxu1 %v1005_v19  ;;  %v1010_v42 = vld [vmem:[#allocation5 + $0xa4] ss:$24 sps:$4 sm:$0xff]   ;;  %v1008_v43 = vld [vmem:[#allocation5 + $0xa0] ss:$24 sps:$4 sm:$0xff]   ;;  %v1016_v45 = vld [vmem:[#allocation5 + $0xd4] ss:$24 sps:$4 sm:$0xff]  }
  0x47   :  { %367 = vmatpush1.bf16.msra.mxu0 %v975_v8  ;;  %409 = vmatprep.subr.bf16.mxu1 %v1006_v20  ;;  %v1014_v47 = vld [vmem:[#allocation5 + $0xd0] ss:$24 sps:$4 sm:$0xff]   ;;  %v1022_v49 = vld [vmem:[#allocation5 + $0x104] ss:$24 sps:$4 sm:$0xff]   ;;  %v1020_v50 = vld [vmem:[#allocation5 + $0x100] ss:$24 sps:$4 sm:$0xff]  }
  0x48   :  { %368 = vmatprep.subr.bf16.mxu0 %v976_v9  ;;  %v1037_v48 = vld [vmem:[#allocation7 + $0x8] sm:$0xff]   ;;  %v1034_v53 = vld [vmem:[#allocation5 + $0x164] ss:$24 sps:$4 sm:$0xff]   ;;  %v1032_v54 = vld [vmem:[#allocation5 + $0x160] ss:$24 sps:$4 sm:$0xff]   ;;  %v1237_v62 = vshrl.u32 %v500_v61, 7 }
  0x49   :  { %v1028_v51 = vld [vmem:[#allocation5 + $0x134] ss:$24 sps:$4 sm:$0xff]   ;;  %v1026_v52 = vld [vmem:[#allocation5 + $0x130] ss:$24 sps:$4 sm:$0xff]   ;;  %v1039_v56 = vld [vmem:[#allocation7 + $0x18] sm:$0xff]   ;;  %v1152_v10 = vmov 3  }
  0x4a   :  { %410 = vmatpush1.bf16.msra.mxu1 %v1011_v22  ;;  %v1038_v55 = vld [vmem:[#allocation7 + $0x10] sm:$0xff]   ;;  %v1040_v57 = vld [vmem:[#allocation7 + $0x20] sm:$0xff]   ;;  %v1041_v58 = vld [vmem:[#allocation7 + $0x28] sm:$0xff]   ;;  %v502_v63 = vadd.s32 8, %v1237_v62  ;;  %v507_v2 = vand.u32 1, %v1237_v62  ;;  %v754_v15 = vsub.s32 1, %v1237_v62 }
  0x4b   :  { %369 = vmatpush1.bf16.msra.mxu0 %v978_v13  ;;  %411 = vmatprep.subr.bf16.mxu1 %v1012_v24  ;;  %v1042_v59 = vld [vmem:[#allocation7 + $0x30] sm:$0xff]   ;;  %v1043_v60 = vld [vmem:[#allocation7 + $0x38] sm:$0xff]  }
  0x4c   :  { %370 = vmatprep.subr.bf16.mxu0 %v979_v14  ;;  %v514_v3 = vand.u32 1, %v502_v63  ;;  %vm1248_vm1 = vcmp.eq.s32.totalorder %v507_v2, 0  ;;  %vm1252_vm2 = vcmp.eq.s32.totalorder %v507_v2, 1  ;;  %v1276_v20 = vld [vmem:[%s1343_s6] sm:$0xf]  ;;  %v651_v63 = vsub.s32 0, %v1237_v62 }
  0x4d   :  { %v883_v12 = vld [vmem:[%s1342_s5] ss:$0 sm:$0xff]  ;;  %s1153_s5 = smov [#allocation8]  }
  0x4e   :  { %412 = vmatpush1.bf16.msra.mxu1 %v1017_v29  ;;  %vm1256_vm3 = vcmp.eq.s32.totalorder %v514_v3, 0  ;;  %vm1260_vm4 = vcmp.eq.s32.totalorder %v514_v3, 1  ;;  %v735_v11 = vrot.slane %v1276_v20, %v651_v63  ;;  %s813_s22 = sshll.u32 %s1153_s5, 4  ;;  %s814_s22 = int_to_ptr.vmem [resolvable:$true] %s813_s22 }
  0x4f   :  { %371 = vmatpush1.bf16.msra.mxu0 %v981_v17  ;;  %413 = vmatprep.subr.bf16.mxu1 %v1018_v30  ;;  %s1110_s23 = scalar_lea.vmem %s814_s22, 256  ;;  %p1115_p11 = scmp.lt.s32.totalorder %s814_s22, %s814_s22 }
  0x50   :  { %372 = vmatprep.subr.bf16.mxu0 %v982_v18  ;;  %p1111_p10 = scmp.ne.s32.totalorder %s814_s22, %s1110_s23  ;;  %p1116_p12 = scmp.lt.s32.totalorder %s1110_s23, %s1110_s23 }
  0x52   :  { %414 = vmatpush1.bf16.msra.mxu1 %v1023_v33  ;;  %p1117_p13 = por %p1116_p12, %p1115_p11 }
  0x53   :  { %373 = vmatpush1.bf16.msra.mxu0 %v984_v21  ;;  %415 = vmatprep.subr.bf16.mxu1 %v1024_v35 }
  0x54   :  { %374 = vmatprep.subr.bf16.mxu0 %v985_v23  ;;  %p1118_p0 = pnand %p1117_p13, %p1111_p10 }
  0x56   :  { %416 = vmatpush1.bf16.msra.mxu1 %v1029_v37 }
  0x57   :  { %375 = vmatpush1.bf16.msra.mxu0 %v987_v25  ;;  %417 = vmatprep.subr.bf16.mxu1 %v1030_v39  ;;  %v755_v25 = vrot.slane %v1276_v20, %v754_v15 }
  0x58   :  { %446 = vmatprep.subr.bf16.mxu0 %v992_v28 }
  0x5a   :  { %393 = vmatmul.mubr.bf16.vlgmr.msra.gmra.mrb[0].mxu0 %v71_v31  ;;  %418 = vmatpush1.bf16.msra.mxu1 %v1035_v41 }
  0x5b   :  { %447 = vmatpush1.bf16.msra.mxu0 %v990_v32  ;;  %478 = vmatprep.mubr.bf16.mxu0 %v1147_v0  ;;  %v874_v0 = vld [vmem:[%s1339_s2] ss:$0 sm:$0xff] }
  0x5c   :  { %448 = vmatprep.subr.bf16.mxu0 %v998_v34  ;;  %902 = vmatprep.subr.bf16.mxu1 %v1148_v46 }
  0x5d   :  { %436 = vmatmul.mubr.bf16.vlgmr.msra.gmra.mrb[0].mxu1 %v71_v31 }
  0x5e   :  { %903 = vmatpush3.bf16.msra.mxu1 %v1036_v44  ;;  %918 = vmatprep.mubr.msk.bf16.mxu1 %vm1149_vm0, %v1148_v46 }
  0x5f   :  { %449 = vmatpush1.bf16.msra.mxu0 %v996_v36  ;;  %904 = vmatprep.subr.bf16.mxu1 %v1148_v46 }
  0x60   :  { %450 = vmatprep.subr.bf16.mxu0 %v1004_v38 }
  0x62   :  { %905 = vmatpush3.bf16.msra.mxu1 %v1037_v48 }
  0x63   :  { %451 = vmatpush1.bf16.msra.mxu0 %v1002_v40  ;;  %906 = vmatprep.subr.bf16.mxu1 %v1148_v46 }
  0x64   :  { %452 = vmatprep.subr.bf16.mxu0 %v1010_v42 }
  0x66   :  { %907 = vmatpush3.bf16.msra.mxu1 %v1038_v55 }
  0x67   :  { %453 = vmatpush1.bf16.msra.mxu0 %v1008_v43  ;;  %908 = vmatprep.subr.bf16.mxu1 %v1148_v46 }
  0x68   :  { %454 = vmatprep.subr.bf16.mxu0 %v1016_v45 }
  0x6a   :  { %909 = vmatpush3.bf16.msra.mxu1 %v1039_v56 }
  0x6b   :  { %455 = vmatpush1.bf16.msra.mxu0 %v1014_v47  ;;  %910 = vmatprep.subr.bf16.mxu1 %v1148_v46  ;;  %v790_v47 = vsub.s32 3, %v1237_v62 }
  0x6c   :  { %456 = vmatprep.subr.bf16.mxu0 %v1022_v49 }
  0x6d   :  { %v791_v49 = vrot.slane %v1276_v20, %v790_v47 }
  0x6e   :  { %911 = vmatpush3.bf16.msra.mxu1 %v1040_v57 }
  0x6f   :  { %457 = vmatpush1.bf16.msra.mxu0 %v1020_v50  ;;  %912 = vmatprep.subr.bf16.mxu1 %v1148_v46 }
  0x70   :  { %458 = vmatprep.subr.bf16.mxu0 %v1028_v51 }
  0x72   :  { %913 = vmatpush3.bf16.msra.mxu1 %v1041_v58 }
  0x73   :  { %459 = vmatpush1.bf16.msra.mxu0 %v1026_v52  ;;  %914 = vmatprep.subr.bf16.mxu1 %v1148_v46 }
  0x74   :  { %460 = vmatprep.subr.bf16.mxu0 %v1034_v53 }
  0x76   :  { %915 = vmatpush3.bf16.msra.mxu1 %v1042_v59 }
  0x77   :  { %461 = vmatpush1.bf16.msra.mxu0 %v1032_v54  ;;  %916 = vmatprep.subr.bf16.mxu1 %v1148_v46 }
  0x78   :  { %922 = vmatprep.subr.bf16.mxu0 %v1148_v46 }
  0x7a   :  { %479 = vmatmul.mubr.bf16.vlgmr.msra.gmra.mrb[4].mxu0 %v71_v31  ;;  %917 = vmatpush3.bf16.msra.mxu1 %v1043_v60 }
  0x7b   :  { %923 = vmatpush3.bf16.msra.mxu0 %v1036_v44  ;;  %938 = vmatprep.mubr.msk.bf16.mxu0 %vm1149_vm0, %v1148_v46 }
  0x7c   :  { %924 = vmatprep.subr.bf16.mxu0 %v1148_v46 }
  0x7f   :  { %925 = vmatpush3.bf16.msra.mxu0 %v1037_v48 }
  0x80   :  { %926 = vmatprep.subr.bf16.mxu0 %v1148_v46 }
  0x83   :  { %927 = vmatpush3.bf16.msra.mxu0 %v1038_v55 }
  0x84   :  { %928 = vmatprep.subr.bf16.mxu0 %v1148_v46 }
  0x87   :  { %929 = vmatpush3.bf16.msra.mxu0 %v1039_v56 }
  0x88   :  { %930 = vmatprep.subr.bf16.mxu0 %v1148_v46 }
  0x8b   :  { %931 = vmatpush3.bf16.msra.mxu0 %v1040_v57 }
  0x8c   :  { %932 = vmatprep.subr.bf16.mxu0 %v1148_v46 }
  0x8f   :  { %933 = vmatpush3.bf16.msra.mxu0 %v1041_v58  ;;  %v1150_v58 = vmov 1  }
  0x90   :  { %934 = vmatprep.subr.bf16.mxu0 %v1148_v46  ;;  %959 = vset.pattern.permute.xlu1 %v1150_v58 }
  0x93   :  { %935 = vmatpush3.bf16.msra.mxu0 %v1042_v59  ;;  %v560_v59 = vld [vmem:[%s1341_s4] sm:$0x1] }
  0x94   :  { %936 = vmatprep.subr.bf16.mxu0 %v1148_v46  ;;  %v772_v46 = vsub.s32 2, %v1237_v62 }
  0x96   :  { %v773_v48 = vrot.slane %v1276_v20, %v772_v46 }
  0x97   :  { %937 = vmatpush3.bf16.msra.mxu0 %v1043_v60 }
 0x12d   :  { %v394_v1 = vpop.f32.mrb[0].mxu0 }
 0x12e   :  { %v496_v4 = vadd.f32 %v874_v0, %v394_v1  ;;  %v1244_v5 = vpop.f32.mrb[1].mxu0 }
 0x12f   :  { %v398_v6 = vpop.f32.mrb[2].mxu0 }
 0x130   :  { %v498_v7 = vmax.f32 %v496_v4, 0.0  ;;  %v497_v8 = vadd.f32 %v874_v0, %v398_v6  ;;  %v1246_v9 = vpop.f32.mrb[3].mxu0  ;;  %v1279_v28 = vpop.f32.mrb[0].mxu1 }
 0x131   :  { %v439_v29 = vpop.f32.mrb[1].mxu1  ;;  %v736_v13 = vadd.f32 %v735_v11, %v1279_v28  ;;  %v731_v20 = vadd.f32 %v883_v12, %v1246_v9 }
 0x132   :  { %v499_v14 = vmax.f32 %v497_v8, 0.0  ;;  %v533_v16 = vsel %vm1248_vm1, %v498_v7, 0.0  ;;  %v663_v17 = vsel %vm1252_vm2, %v498_v7, 0.0  ;;  %v1281_v32 = vadd.f32 %v755_v25, %v439_v29  ;;  %v1283_v33 = vpop.f32.mrb[2].mxu1 }
 0x133   :  { %v443_v34 = vpop.f32.mrb[3].mxu1 }
 0x134   :  { %v534_v18 = vsel %vm1256_vm3, %v499_v14, 0.0  ;;  %v664_v19 = vsel %vm1260_vm4, %v499_v14, 0.0  ;;  %v1285_v37 = vadd.f32 %v755_v25, %v443_v34  ;;  %v730_v25 = vadd.f32 %v883_v12, %v1244_v5 }
 0x135   :  { %v535_v21 = vadd.f32 %v534_v18, %v533_v16  ;;  %v665_v22 = vadd.f32 %v664_v19, %v663_v17 }
 0x137   :  { %v536_v23 = vrot.slane %v535_v21, 4  ;;  %v666_v24 = vrot.slane %v665_v22, 4 }
 0x139   :  { %v537_v26 = vadd.f32 %v536_v23, %v535_v21  ;;  %v667_v27 = vadd.f32 %v666_v24, %v665_v22  ;;  %v1151_v22 = vmov 2  }
 0x13b   :  { %v538_v30 = vrot.slane %v537_v26, 2  ;;  %v668_v31 = vrot.slane %v667_v27, 2 }
 0x13d   :  { %v539_v35 = vadd.f32 %v538_v30, %v537_v26  ;;  %v669_v36 = vadd.f32 %v668_v31, %v667_v27  ;;  %v737_v27 = vadd.f32 %v735_v11, %v1283_v33 }
 0x13f   :  { %v540_v38 = vrot.slane %v539_v35, 1  ;;  %v670_v39 = vrot.slane %v669_v36, 1 }
 0x141   :  { %v541_v40 = vadd.f32 %v540_v38, %v539_v35  ;;  %v671_v41 = vadd.f32 %v670_v39, %v669_v36 }
 0x143   :  { %v542_v42 = vmul.f32 0.125, %v541_v40  ;;  %v672_v43 = vmul.f32 0.125, %v671_v41 }
 0x145   :  { %v543_v44 = vpack.c.bf16 %v542_v42, %v542_v42  ;;  %v673_v45 = vpack.c.bf16 %v672_v43, %v672_v43 }
 0x147   :  { %919 = vmatmul.mubr.bf16.vlgmr.msra.gmra.mrb[4].mxu1 %v543_v44  ;;  %939 = vmatmul.mubr.bf16.vlgmr.msra.gmra.mrb[8].mxu0 %v673_v45 }
 0x14d   :  { %v480_v50 = vpop.f32.mrb[4].mxu0 }
 0x14e   :  { %v1291_v51 = vadd.f32 %v773_v48, %v480_v50  ;;  %v482_v52 = vpop.f32.mrb[5].mxu0 }
 0x14f   :  { %v1293_v53 = vadd.f32 %v791_v49, %v482_v52  ;;  %v484_v54 = vpop.f32.mrb[6].mxu0 }
 0x150   :  { %v775_v55 = vadd.f32 %v773_v48, %v484_v54  ;;  %v486_v56 = vpop.f32.mrb[7].mxu0 }
 0x151   :  { %v1295_v57 = vadd.f32 %v791_v49, %v486_v56 }
 0x21a   :  { %v643_v60 = vpop.f32.mrb[4].mxu1  ;;  %v708_v61 = vpop.f32.mrb[8].mxu0 }
 0x21b   :  { %v644_v0 = vadd.f32 %v643_v60, %v560_v59  ;;  %v709_v1 = vadd.f32 %v708_v61, %v560_v59  ;;  %v920_v2 = vpop.f32.mrb[5].mxu1  ;;  %v940_v3 = vpop.f32.mrb[9].mxu0 }
 0x21c   :  { %v646_v4 = vpop.f32.mrb[6].mxu1  ;;  %v711_v6 = vpop.f32.mrb[10].mxu0 }
 0x21d   :  { %v652_v7 = vrot.slane %v644_v0, %v651_v63  ;;  %v717_v8 = vrot.slane %v709_v1, %v651_v63  ;;  %v921_v14 = vpop.f32.mrb[7].mxu1  ;;  %v941_v15 = vpop.f32.mrb[11].mxu0 }
 0x21f   :  { %v653_v16 = vsel %vm1248_vm1, %v652_v7, 0.0  ;;  %v654_v17 = vsel %vm1256_vm3, %v652_v7, 0.0  ;;  %v718_v18 = vsel %vm1252_vm2, %v717_v8, 0.0  ;;  %v719_v62 = vsel %vm1260_vm4, %v717_v8, 0.0 }
 0x220   :  { %v720_v19 = vadd.f32 %v718_v18, %v653_v16  ;;  %v721_v21 = vadd.f32 %v719_v62, %v654_v17 }
 0x222   :  { %759 = vperm.xlu1 %959, %v720_v19   ;;  %740 = vperm.xlu0 %958, %v720_v19  }
 0x226   :  { %763 = vperm.xlu1 %959, %v721_v21   ;;  %745 = vperm.xlu0 %958, %v721_v21  }
 0x22a   :  { %961 = vset.pattern.permute.xlu1 %v1151_v22  ;;  %960 = vset.pattern.permute.xlu0 %v1151_v22 }
 0x22b   :  { %781 = vperm.xlu1 %961, %v721_v21   ;;  %777 = vperm.xlu0 %960, %v720_v19  }
 0x22f   :  { %962 = vset.pattern.permute.xlu1 %v1152_v10  ;;  %963 = vset.pattern.permute.xlu0 %v1152_v10 }
 0x230   :  { %795 = vperm.xlu1 %962, %v720_v19   ;;  %799 = vperm.xlu0 %963, %v721_v21  }
 0x2a1   :  { %v760_v23 = vpop.permute.xlu1 %759  ;;  %v741_v24 = vpop.permute.xlu0 %740 }
 0x2a2   :  { %v748_v26 = vmul.f32 %v741_v24, %v736_v13  ;;  %v766_v29 = vmul.f32 %v760_v23, %v1281_v32 }
 0x2a4   :  { %v750_v30 = vadd.f32 %v748_v26, %v730_v25 }
 0x2a5   :  { %v764_v31 = vpop.permute.xlu1 %763  ;;  %v746_v34 = vpop.permute.xlu0 %745 }
 0x2a6   :  { %v749_v35 = vmul.f32 %v746_v34, %v737_v27  ;;  %v768_v36 = vadd.f32 %v766_v29, %v750_v30  ;;  %v767_v38 = vmul.f32 %v764_v31, %v1285_v37 }
 0x2a8   :  { %v751_v39 = vadd.f32 %v749_v35, %v731_v20 }
 0x2aa   :  { %v782_v28 = vpop.permute.xlu1 %781  ;;  %v769_v40 = vadd.f32 %v767_v38, %v751_v39  ;;  %v778_v41 = vpop.permute.xlu0 %777 }
 0x2ab   :  { %v785_v42 = vmul.f32 %v782_v28, %v775_v55  ;;  %v784_v5 = vmul.f32 %v778_v41, %v1291_v51 }
 0x2ad   :  { %v787_v43 = vadd.f32 %v785_v42, %v769_v40  ;;  %v786_v33 = vadd.f32 %v784_v5, %v768_v36 }
 0x2af   :  { %v796_v44 = vpop.permute.xlu1 %795  ;;  %v800_v32 = vpop.permute.xlu0 %799 }
 0x2b0   :  { %v802_v45 = vmul.f32 %v796_v44, %v1293_v53  ;;  %v803_v9 = vmul.f32 %v800_v32, %v1295_v57 }
 0x2b2   :  { %v804_v46 = vadd.f32 %v802_v45, %v786_v33  ;;  %v805_v47 = vadd.f32 %v803_v9, %v787_v43 }
 0x2b4   :  { %806 = vst [vmem:[#allocation8] sm:$0xff] %v804_v46  ;;  %807 = vst [vmem:[#allocation8 + $0x8] sm:$0xff] %v805_v47 }
 0x2b5   :  { %1121 = shalt.err (!%p1118_p0)
}
 0x2b6   :  { %s1122_s27 = scalar_lea.hbm %s1344_s7, 256 }
 0x2b7   :  { %p1123_p1 = scmp.ne.s32.totalorder %s1344_s7, %s1122_s27  ;;  %p1126_p2 = scmp.lt.u32.totalorder %s1122_s27, %s1344_s7 }
 0x2b9   :  { %p1128_p3 = pnand %p1126_p2, %p1123_p1 }
 0x2bb   :  { %1131 = shalt.err (!%p1128_p3)
}
 0x2bc   :  { %819 = dma.vmem_to_hbm [thread:$0]  %s814_s22, 256, %s1344_s7, [#allocation4], %s1142_s1, %s1142_s1, %s1143_s25  }
 0x2bd   :  { %1136 = dma.done.wait [#allocation4], 256  }
 0x2be   :  { %1137 = vsyncadd [#allocation4], 4294967040 }
 0x2bf   :  { %823 = vsyncpa [#allocation3], 1 }
 0x2c0   :  { %824 = vsyncpa [#allocation6], 1 }
 0x2c1   :  { %825 = vsyncpa [#allocation4], 1 }

</bundles_post_ra>
